<compile_context>
chip_gen: v7x
topology: tpu7x:2x2x1
jax: 0.10.0
libtpu: 0.0.40
codegen_flags: <defaults>
</compile_context>

<pallas_src>
import functools

import numpy as np
import jax
import jax.numpy as jnp
from jax import lax
from jax.experimental import pallas as pl
from jax.experimental.pallas import tpu as pltpu


_TILE_P_MAX = 8192      # lane-tile upper bound


# ---------------------------------------------------------------------------
# VMEM / tile planning
# ---------------------------------------------------------------------------
def _vmem_limit_bytes():
    """Per-generation VMEM limit (v7x: 64 MiB physical, v5e/v6e: 128 MiB)."""
    try:
        cap = int(pltpu.get_tpu_info().vmem_capacity_bytes)
    except Exception:                      # conservative default = v7x
        cap = 64 << 20
    return int(cap * 3 // 4)


def _pick_tile_p(c, hw, vmem_limit, tile_p_max):
    """Largest 128-multiple lane tile whose working set fits the VMEM budget."""
    if hw < 128:
        return int(hw)                     # full-dim block (exempt from 128-lane rule)
    budget = int(vmem_limit * 0.6)         # headroom for compiler temporaries
    # per lane: double-buffered logits+target inputs, ~3C f32 of in-kernel
    # temporaries, resident accumulators/masks (single double-buffer factor).
    bytes_per_lane = (2 * (c + 1) + 3 * c + 8) * 4
    t = max(128, (budget // bytes_per_lane) // 128 * 128)
    return int(min(t, tile_p_max, hw // 128 * 128))


# ---------------------------------------------------------------------------
# Fused Pallas kernel: softmax + true-class gather + OHEM mask + reduction
# ---------------------------------------------------------------------------
def _ohem_ce_kernel(thr_ref, x_ref, t_ref, loss_ref, cnt_ref, *, ignore_label, hw):
    i = pl.program_id(1)

    @pl.when(i == 0)
    def _():
        loss_ref[...] = jnp.zeros_like(loss_ref)
        cnt_ref[...] = jnp.zeros_like(cnt_ref)

    x = x_ref[...].astype(jnp.float32)                       # (C, TP)
    t = t_ref[...]                                           # (1, TP) int32

    m = jnp.max(x, axis=0, keepdims=True)                    # (1, TP)
    s = jnp.sum(jnp.exp(x - m), axis=0, keepdims=True)       # (1, TP)
    onehot = lax.broadcasted_iota(jnp.int32, x.shape, 0) == t
    x_t = jnp.sum(jnp.where(onehot, x, 0.0), axis=0, keepdims=True)   # (1, TP)
    logp_t = x_t - m - jnp.log(s)                            # true-class log-prob
    p_t = jnp.exp(x_t - m) / s                               # exact, (1,TP) divide only

    tile_p = x.shape[-1]
    lane = lax.broadcasted_iota(jnp.int32, (1, tile_p), 1)
    in_bounds = (i * tile_p + lane) < hw                     # ragged-tail lane mask

    thr = thr_ref[0]                                         # scalar from SMEM
    valid = jnp.logical_and(t != ignore_label, in_bounds)
    kept = jnp.logical_and(valid, p_t <= thr)                # OHEM keep mask

    # lane-dense elementwise accumulation; tiny cross-lane sum happens in XLA.
    loss_ref[...] += jnp.where(kept, -logp_t, 0.0)
    cnt_ref[...] += kept.astype(jnp.float32)


def _ohem_ce_pallas(thr, x3d, t3d, *, ignore_label, tile_p, vmem_limit):
    n, c, hw = x3d.shape
    grid = (n, pl.cdiv(hw, tile_p))
    kern = functools.partial(_ohem_ce_kernel, ignore_label=ignore_label, hw=hw)
    return pl.pallas_call(
        kern,
        out_shape=(
            jax.ShapeDtypeStruct((n, 1, tile_p), jnp.float32),   # loss partials
            jax.ShapeDtypeStruct((n, 1, tile_p), jnp.float32),   # kept-count partials
        ),
        grid_spec=pltpu.PrefetchScalarGridSpec(
            num_scalar_prefetch=0,
            grid=grid,
            in_specs=[
                pl.BlockSpec(memory_space=pltpu.MemorySpace.SMEM),          # thr (1,)
                pl.BlockSpec((None, c, tile_p), lambda b, i: (b, 0, i)),    # logits
                pl.BlockSpec((None, 1, tile_p), lambda b, i: (b, 0, i)),    # target
            ],
            out_specs=[
                pl.BlockSpec((None, 1, tile_p), lambda b, i: (b, 0, 0)),    # resident acc
                pl.BlockSpec((None, 1, tile_p), lambda b, i: (b, 0, 0)),
            ],
        ),
        compiler_params=pltpu.CompilerParams(
            dimension_semantics=("parallel", "arbitrary"),
            vmem_limit_bytes=vmem_limit,
        ),
    )(thr, x3d, t3d)


# ---------------------------------------------------------------------------
# On-device OHEM threshold search (tiny XLA epilogue, no host sync)
# ---------------------------------------------------------------------------
def _zoom_out_size(size, factor):
    return max(int(round(size * (1.0 / factor))), 1)


def _zoom_coords(in_size, out_size):
    if out_size <= 1:
        return np.zeros((max(out_size, 1),), dtype=np.float64)
    return np.arange(out_size, dtype=np.float64) * (in_size - 1) / (out_size - 1)


def _threshold_on_device(predict, target, ignore_label, thresh, min_kept, factor):
    """JAX port of OhemCrossEntropy2d.find_threshold, from corner LOGITS only."""
    n, c, h, w = predict.shape
    out_h = _zoom_out_size(h, factor)
    out_w = _zoom_out_size(w, factor)
    ys = _zoom_coords(h, out_h)
    xs = _zoom_coords(w, out_w)
    y0 = np.floor(ys).astype(np.int32); y1 = np.minimum(y0 + 1, h - 1).astype(np.int32)
    x0 = np.floor(xs).astype(np.int32); x1 = np.minimum(x0 + 1, w - 1).astype(np.int32)
    wy = (ys - y0).astype(np.float32)[None, :, None]          # (1, oh, 1)
    wx = (xs - x0).astype(np.float32)[None, None, :]          # (1, 1, ow)

    # nearest (order=0) downsample of the target
    # TODO(synk): floor(x+0.5) is not bit-exact with scipy.ndimage order=0 at .5 boundaries
    ry = np.clip(np.floor(ys + 0.5).astype(np.int32), 0, h - 1)
    rx = np.clip(np.floor(xs + 0.5).astype(np.int32), 0, w - 1)
    tgt_ds = target[:, ry][:, :, rx]                          # (n, oh, ow)
    valid = tgt_ds != ignore_label
    label_safe = jnp.where(valid, tgt_ds, 0).astype(jnp.int32)

    # true-class softmax prob at the 4 bilinear corner pixels, gathered straight
    # from the logits.  Class gathered BEFORE interpolation: identical math to
    # interpolating the full prob map (interpolation is per-channel linear),
    # but C-times smaller intermediates and no full-res prob map at all.
    r0 = predict[:, :, y0, :]                                 # (n, c, oh, w)
    r1 = predict[:, :, y1, :]

    def corner_true_prob(rows, cols):
        lx = rows[:, :, :, cols]                              # (n, c, oh, ow)
        m = jnp.max(lx, axis=1, keepdims=True)
        s = jnp.sum(jnp.exp(lx - m), axis=1, keepdims=True)
        x_t = jnp.take_along_axis(lx, label_safe[:, None], axis=1)
        return (jnp.exp(x_t - m) / s)[:, 0]                   # (n, oh, ow)

    p00 = corner_true_prob(r0, x0); p01 = corner_true_prob(r0, x1)
    p10 = corner_true_prob(r1, x0); p11 = corner_true_prob(r1, x1)
    pred = (p00 * (1.0 - wy) * (1.0 - wx) + p01 * (1.0 - wy) * wx
            + p10 * wy * (1.0 - wx) + p11 * wy * wx)          # (n, oh, ow)

    m_px = n * out_h * out_w
    pred_flat = pred.reshape(m_px)
    valid_flat = valid.reshape(m_px)
    num_valid = jnp.sum(valid_flat.astype(jnp.int32))
    min_kept_ds = min_kept // (factor * factor)
    if min_kept_ds > 0:
        # k-th smallest true-class prob among valid pixels (invalids pushed to
        # +inf).  This value is only used when num_valid > min_kept_ds — the
        # where() below overrides with 1.0 otherwise — so the k-th entry is
        # always a finite valid value.  Keep that invariant if editing.
        k = min(min_kept_ds, m_px)
        topk_vals, _ = lax.top_k(-jnp.where(valid_flat, pred_flat, jnp.inf), k)
        kth_smallest = -topk_vals[k - 1]
        candidate = jnp.maximum(jnp.float32(thresh), kth_smallest)
    else:
        candidate = jnp.float32(thresh)
    threshold = jnp.where(min_kept_ds >= num_valid, jnp.float32(1.0), candidate)
    return threshold.reshape(1).astype(jnp.float32)


# ---------------------------------------------------------------------------
# Public wrapper = OhemCrossEntropy2d.forward (single jit, no host round trip)
# ---------------------------------------------------------------------------
@functools.partial(jax.jit, static_argnames=(
    "ignore_label", "thresh", "min_kept", "factor", "tile_p_max"))
def _ohem_forward(predict, target, *, ignore_label, thresh, min_kept, factor,
                  tile_p_max):
    n, c, h, w = predict.shape
    hw = h * w
    # NCHW -> (N, C, H*W): pure reshape, no transpose and no padding copies.
    x3d = predict.reshape(n, c, hw).astype(jnp.float32)
    t3d = target.reshape(n, 1, hw).astype(jnp.int32)

    # (1) OHEM threshold, fully on device, from a factor^2-downsampled view
    #     computed directly on gathered corner logits (no full prob map).
    thr = _threshold_on_device(predict.astype(jnp.float32),
                               target.astype(jnp.int32),
                               ignore_label, thresh, min_kept, factor)

    # (2) single fused Pallas pass over the logits: softmax + true-class gather
    #     + OHEM keep mask + lane-dense loss/count accumulation.
    vmem_limit = _vmem_limit_bytes()
    tile_p = _pick_tile_p(c, hw, vmem_limit, tile_p_max)
    loss_parts, cnt_parts = _ohem_ce_pallas(
        thr, x3d, t3d, ignore_label=ignore_label, tile_p=tile_p,
        vmem_limit=vmem_limit)

    # (3) mean over kept pixels (== CrossEntropyLoss(ignore_index) on the new
    #     target; NaN if nothing is kept, matching the reference behaviour).
    return jnp.sum(loss_parts) / jnp.sum(cnt_parts)


def ohem_cross_entropy_2d(predict, target, *, ignore_label=255, thresh=0.7,
                          min_kept=100000, factor=8, tile_p_max=_TILE_P_MAX):
    return _ohem_forward(predict, target,
                         ignore_label=int(ignore_label), thresh=float(thresh),
                         min_kept=int(min_kept), factor=int(factor),
                         tile_p_max=int(tile_p_max))


# ---------------------------------------------------------------------------
# Pure-NumPy reference (for the correctness check only)
# ---------------------------------------------------------------------------
def _zoom_linear_hw(x, out_h, out_w):
    n, c, h, w = x.shape
    ys = _zoom_coords(h, out_h)
    xs = _zoom_coords(w, out_w)
    y0 = np.floor(ys).astype(np.int64); y1 = np.minimum(y0 + 1, h - 1)
    wy = (ys - y0)[None, None, :, None]
    x0 = np.floor(xs).astype(np.int64); x1 = np.minimum(x0 + 1, w - 1)
    wx = (xs - x0)[None, None, None, :]
    a = x[:, :, y0][:, :, :, x0]
    b = x[:, :, y0][:, :, :, x1]
    cc = x[:, :, y1][:, :, :, x0]
    d = x[:, :, y1][:, :, :, x1]
    return a * (1 - wy) * (1 - wx) + b * (1 - wy) * wx + cc * wy * (1 - wx) + d * wy * wx


def _zoom_nearest_hw(t, out_h, out_w):
    n, h, w = t.shape
    ys = np.clip(np.floor(_zoom_coords(h, out_h) + 0.5).astype(np.int64), 0, h - 1)
    xs = np.clip(np.floor(_zoom_coords(w, out_w) + 0.5).astype(np.int64), 0, w - 1)
    return t[:, ys][:, :, xs]


def _find_threshold(np_predict, np_target, ignore_label, thresh, min_kept, factor):
    n, c, h, w = np_predict.shape
    out_h = _zoom_out_size(h, factor)
    out_w = _zoom_out_size(w, factor)
    predict = _zoom_linear_hw(np_predict, out_h, out_w)
    target = _zoom_nearest_hw(np_target, out_h, out_w)
    min_kept = min_kept // (factor * factor)
    input_label = target.ravel().astype(np.int32)
    input_prob = np.rollaxis(predict, 1).reshape((c, -1))
    valid_flag = input_label != ignore_label
    label = input_label[valid_flag]
    num_valid = valid_flag.sum()
    if min_kept >= num_valid:
        threshold = 1.0
    elif num_valid > 0:
        prob = input_prob[:, valid_flag]
        pred = prob[label, np.arange(len(label), dtype=np.int32)]
        threshold = thresh
        if min_kept > 0:
            k_th = min(len(pred), min_kept) - 1
            new_array = np.partition(pred, k_th)
            new_threshold = new_array[k_th]
            if new_threshold > thresh:
                threshold = new_threshold
    else:
        threshold = 1.0
    return float(threshold)


def _reference_loss(np_predict, np_target, ignore_label, thresh, min_kept, factor):
    n, c, h, w = np_predict.shape
    x = np_predict.astype(np.float32)
    m = x.max(axis=1, keepdims=True)
    e = np.exp(x - m)
    s = e.sum(axis=1, keepdims=True)
    prob = e / s
    threshold = _find_threshold(prob, np_target, ignore_label, thresh, min_kept, factor)
    logp = (x - m) - np.log(s)
    t = np_target.reshape(n, h, w)
    valid = t != ignore_label
    tc = np.where(valid, t, 0)
    p_t = np.take_along_axis(prob, tc[:, None], axis=1)[:, 0]
    logp_t = np.take_along_axis(logp, tc[:, None], axis=1)[:, 0]
    kept = valid & (p_t <= threshold)
    if kept.sum() == 0:
        return float("nan")
    return float((-logp_t[kept]).mean())


# ---------------------------------------------------------------------------
if __name__ == "__main__":
    key = jax.random.PRNGKey(0)
    N, C, H, W = 2, 4, 16, 16
    IGNORE = 255
    k1, k2, k3 = jax.random.split(key, 3)

    predict = jax.random.normal(k1, (N, C, H, W), dtype=jnp.float32) * 3.0
    target = jax.random.randint(k2, (N, H, W), 0, C).astype(jnp.int32)
    ignore_mask = jax.random.uniform(k3, (N, H, W)) < 0.1
    target = jnp.where(ignore_mask, IGNORE, target)

    # min_kept / factor chosen so the downsample + top-k threshold path executes
    loss = ohem_cross_entropy_2d(predict, target, ignore_label=IGNORE,
                                 thresh=0.7, min_kept=64, factor=2)
    loss = jax.block_until_ready(loss)

    ref = _reference_loss(np.asarray(predict), np.asarray(target),
                          IGNORE, 0.7, 64, 2)
    np.testing.assert_allclose(float(loss), ref, rtol=1e-4, atol=1e-6)
    print("KERNEL_OK")
</pallas_src>

<mosaic_0001>
module attributes {stable_mosaic.version = 11 : i64} {
  func.func @_ohem_ce_kernel(%arg0: i32, %arg1: i32, %arg2: memref<1xf32, #tpu.memory_space<smem>>, %arg3: memref<1x4x256xf32, #tpu.memory_space<vmem>>, %arg4: memref<1x1x256xi32, #tpu.memory_space<vmem>>, %arg5: memref<1x1x256xf32, #tpu.memory_space<vmem>>, %arg6: memref<1x1x256xf32, #tpu.memory_space<vmem>>) attributes {dimension_semantics = [#tpu.dimension_semantics<parallel>, #tpu.dimension_semantics<arbitrary>], iteration_bounds = array<i64: 2, 1>, scalar_prefetch = 0 : i64, scratch_operands = 0 : i64, tpu.core_type = #tpu.core_type<tc>, window_params = [{transform_indices = @transform_0, window_bounds = array<i64: 1>}, {transform_indices = @transform_1, window_bounds = array<i64: 1, 4, 256>}, {transform_indices = @transform_2, window_bounds = array<i64: 1, 1, 256>}, {transform_indices = @transform_3, window_bounds = array<i64: 1, 1, 256>}, {transform_indices = @transform_4, window_bounds = array<i64: 1, 1, 256>}]} {
    %c0_i32 = arith.constant 0 : i32
    %0 = arith.cmpi eq, %arg1, %c0_i32 : i32
    %1 = arith.extui %0 : i1 to i32
    %c0_i32_0 = arith.constant 0 : i32
    %2 = arith.cmpi ne, %1, %c0_i32_0 : i32
    scf.if %2 {
      %cst_25 = arith.constant 0.000000e+00 : f32
      %58 = vector.broadcast %cst_25 : f32 to vector<1x256xf32>
      %c0_26 = arith.constant 0 : index
      %c0_27 = arith.constant 0 : index
      %c0_28 = arith.constant 0 : index
      %59 = vector.load %arg5[%c0_26, %c0_27, %c0_28] : memref<1x1x256xf32, #tpu.memory_space<vmem>>, vector<1x1x256xf32>
      %60 = vector.shape_cast %59 : vector<1x1x256xf32> to vector<1x256xf32>
      %61 = vector.shape_cast %58 : vector<1x256xf32> to vector<1x1x256xf32>
      tpu.vector_store %arg5[%c0_26, %c0_27, %c0_28], %61 {strides = array<i32>} : memref<1x1x256xf32, #tpu.memory_space<vmem>>, vector<1x1x256xf32>,
      %cst_29 = arith.constant 0.000000e+00 : f32
      %62 = vector.broadcast %cst_29 : f32 to vector<1x256xf32>
      %c0_30 = arith.constant 0 : index
      %c0_31 = arith.constant 0 : index
      %c0_32 = arith.constant 0 : index
      %63 = vector.load %arg6[%c0_30, %c0_31, %c0_32] : memref<1x1x256xf32, #tpu.memory_space<vmem>>, vector<1x1x256xf32>
      %64 = vector.shape_cast %63 : vector<1x1x256xf32> to vector<1x256xf32>
      %65 = vector.shape_cast %62 : vector<1x256xf32> to vector<1x1x256xf32>
      tpu.vector_store %arg6[%c0_30, %c0_31, %c0_32], %65 {strides = array<i32>} : memref<1x1x256xf32, #tpu.memory_space<vmem>>, vector<1x1x256xf32>,
    } else {
    }
    %c0 = arith.constant 0 : index
    %c0_1 = arith.constant 0 : index
    %c0_2 = arith.constant 0 : index
    %3 = vector.load %arg3[%c0, %c0_1, %c0_2] : memref<1x4x256xf32, #tpu.memory_space<vmem>>, vector<1x4x256xf32>
    %4 = vector.shape_cast %3 : vector<1x4x256xf32> to vector<4x256xf32>
    %c0_3 = arith.constant 0 : index
    %c0_4 = arith.constant 0 : index
    %c0_5 = arith.constant 0 : index
    %5 = vector.load %arg4[%c0_3, %c0_4, %c0_5] : memref<1x1x256xi32, #tpu.memory_space<vmem>>, vector<1x1x256xi32>
    %6 = vector.shape_cast %5 : vector<1x1x256xi32> to vector<1x256xi32>
    %cst = arith.constant dense<0xFF800000> : vector<256xf32>
    %7 = vector.multi_reduction <maximumf>, %4, %cst [0] : vector<4x256xf32> to vector<256xf32>
    %8 = vector.shape_cast %7 : vector<256xf32> to vector<1x256xf32>
    %9 = vector.broadcast %8 : vector<1x256xf32> to vector<4x256xf32>
    %10 = arith.subf %4, %9 : vector<4x256xf32>
    %11 = math.exp %10 : vector<4x256xf32>
    %cst_6 = arith.constant dense<0.000000e+00> : vector<256xf32>
    %12 = vector.multi_reduction <add>, %11, %cst_6 [0] : vector<4x256xf32> to vector<256xf32>
    %13 = vector.shape_cast %12 : vector<256xf32> to vector<1x256xf32>
    %14 = tpu.iota {dimensions = array<i32: 0>} : vector<4x256xi32>
    %15 = vector.broadcast %6 : vector<1x256xi32> to vector<4x256xi32>
    %16 = arith.cmpi eq, %14, %15 : vector<4x256xi32>
    %cst_7 = arith.constant 0.000000e+00 : f32
    %17 = vector.broadcast %cst_7 : f32 to vector<4x256xf32>
    %18 = arith.select %16, %4, %17 : vector<4x256xi1>, vector<4x256xf32>
    %cst_8 = arith.constant dense<0.000000e+00> : vector<256xf32>
    %19 = vector.multi_reduction <add>, %18, %cst_8 [0] : vector<4x256xf32> to vector<256xf32>
    %20 = vector.shape_cast %19 : vector<256xf32> to vector<1x256xf32>
    %21 = arith.subf %20, %8 : vector<1x256xf32>
    %22 = math.log %13 : vector<1x256xf32>
    %23 = arith.subf %21, %22 : vector<1x256xf32>
    %24 = arith.subf %20, %8 : vector<1x256xf32>
    %25 = math.exp %24 : vector<1x256xf32>
    %26 = arith.divf %25, %13 : vector<1x256xf32>
    %27 = tpu.iota {dimensions = array<i32: 1>} : vector<1x256xi32>
    %c256_i32 = arith.constant 256 : i32
    %28 = arith.muli %arg1, %c256_i32 : i32
    %29 = vector.broadcast %28 : i32 to vector<1x256xi32>
    %30 = arith.addi %29, %27 : vector<1x256xi32>
    %c256_i32_9 = arith.constant 256 : i32
    %31 = vector.broadcast %c256_i32_9 : i32 to vector<1x256xi32>
    %32 = arith.cmpi slt, %30, %31 : vector<1x256xi32>
    %c0_10 = arith.constant 0 : index
    %33 = memref.load %arg2[%c0_10] : memref<1xf32, #tpu.memory_space<smem>>
    %c255_i32 = arith.constant 255 : i32
    %34 = vector.broadcast %c255_i32 : i32 to vector<1x256xi32>
    %35 = arith.cmpi ne, %6, %34 : vector<1x256xi32>
    %36 = arith.andi %35, %32 : vector<1x256xi1>
    %37 = vector.broadcast %33 : f32 to vector<1x256xf32>
    %38 = arith.cmpf ole, %26, %37 : vector<1x256xf32>
    %39 = arith.andi %36, %38 : vector<1x256xi1>
    %c0_11 = arith.constant 0 : index
    %c0_12 = arith.constant 0 : index
    %c0_13 = arith.constant 0 : index
    %40 = vector.load %arg5[%c0_11, %c0_12, %c0_13] : memref<1x1x256xf32, #tpu.memory_space<vmem>>, vector<1x1x256xf32>
    %41 = vector.shape_cast %40 : vector<1x1x256xf32> to vector<1x256xf32>
    %cst_14 = arith.constant 0.000000e+00 : f32
    %42 = vector.broadcast %cst_14 : f32 to vector<1x256xf32>
    %43 = arith.subf %42, %23 : vector<1x256xf32>
    %cst_15 = arith.constant 0.000000e+00 : f32
    %44 = vector.broadcast %cst_15 : f32 to vector<1x256xf32>
    %45 = arith.select %39, %43, %44 : vector<1x256xi1>, vector<1x256xf32>
    %46 = arith.addf %41, %45 : vector<1x256xf32>
    %c0_16 = arith.constant 0 : index
    %c0_17 = arith.constant 0 : index
    %c0_18 = arith.constant 0 : index
    %47 = vector.load %arg5[%c0_16, %c0_17, %c0_18] : memref<1x1x256xf32, #tpu.memory_space<vmem>>, vector<1x1x256xf32>
    %48 = vector.shape_cast %47 : vector<1x1x256xf32> to vector<1x256xf32>
    %49 = vector.shape_cast %46 : vector<1x256xf32> to vector<1x1x256xf32>
    tpu.vector_store %arg5[%c0_16, %c0_17, %c0_18], %49 {strides = array<i32>} : memref<1x1x256xf32, #tpu.memory_space<vmem>>, vector<1x1x256xf32>,
    %c0_19 = arith.constant 0 : index
    %c0_20 = arith.constant 0 : index
    %c0_21 = arith.constant 0 : index
    %50 = vector.load %arg6[%c0_19, %c0_20, %c0_21] : memref<1x1x256xf32, #tpu.memory_space<vmem>>, vector<1x1x256xf32>
    %51 = vector.shape_cast %50 : vector<1x1x256xf32> to vector<1x256xf32>
    %52 = arith.extui %39 : vector<1x256xi1> to vector<1x256xi32>
    %53 = arith.sitofp %52 : vector<1x256xi32> to vector<1x256xf32>
    %54 = arith.addf %51, %53 : vector<1x256xf32>
    %c0_22 = arith.constant 0 : index
    %c0_23 = arith.constant 0 : index
    %c0_24 = arith.constant 0 : index
    %55 = vector.load %arg6[%c0_22, %c0_23, %c0_24] : memref<1x1x256xf32, #tpu.memory_space<vmem>>, vector<1x1x256xf32>
    %56 = vector.shape_cast %55 : vector<1x1x256xf32> to vector<1x256xf32>
    %57 = vector.shape_cast %54 : vector<1x256xf32> to vector<1x1x256xf32>
    tpu.vector_store %arg6[%c0_22, %c0_23, %c0_24], %57 {strides = array<i32>} : memref<1x1x256xf32, #tpu.memory_space<vmem>>, vector<1x1x256xf32>,
    return
  }
  func.func @transform_0(%arg0: i32, %arg1: i32) -> i32 {
    %c0_i32 = arith.constant 0 : i32
    %c0_i32_0 = arith.constant 0 : i32
    return %c0_i32 : i32
  }
  func.func @transform_1(%arg0: i32, %arg1: i32) -> (i32, i32, i32) {
    %c0_i32 = arith.constant 0 : i32
    %c0_i32_0 = arith.constant 0 : i32
    return %arg0, %c0_i32, %arg1 : i32, i32, i32
  }
  func.func @transform_2(%arg0: i32, %arg1: i32) -> (i32, i32, i32) {
    %c0_i32 = arith.constant 0 : i32
    %c0_i32_0 = arith.constant 0 : i32
    return %arg0, %c0_i32, %arg1 : i32, i32, i32
  }
  func.func @transform_3(%arg0: i32, %arg1: i32) -> (i32, i32, i32) {
    %c0_i32 = arith.constant 0 : i32
    %c0_i32_0 = arith.constant 0 : i32
    %c0_i32_1 = arith.constant 0 : i32
    return %arg0, %c0_i32, %c0_i32_0 : i32, i32, i32
  }
  func.func @transform_4(%arg0: i32, %arg1: i32) -> (i32, i32, i32) {
    %c0_i32 = arith.constant 0 : i32
    %c0_i32_0 = arith.constant 0 : i32
    %c0_i32_1 = arith.constant 0 : i32
    return %arg0, %c0_i32, %c0_i32_0 : i32, i32, i32
  }
}

</mosaic_0001>

<bundles_post_ra>
// kernel: _ohem_forward.1
= control target key start
LH: loop header
LB: loop body
LE: loop exit
PB: predicated region body
PF: predicated region fallthrough
CT: control target
= control target key end

     0   :  { %s678_s17 = smov 0   ;;  %s680_s18 = smov 0   ;;  %s760_s0 = inlined_call_operand.<no memory space> [shape: f32[1], index: 0, kind: input, shape index: {}]   ;;  %s761_s1 = inlined_call_operand.vmem [shape: f32[2,4,256], index: 1, kind: input, shape index: {}]   ;;  %s762_s2 = inlined_call_operand.vmem [shape: s32[2,1,256], index: 2, kind: input, shape index: {}]   ;;  %s763_s3 = inlined_call_operand.vmem [shape: f32[2,1,256], index: 3, kind: output, shape index: {0}]   ;;  %s764_s4 = inlined_call_operand.vmem [shape: f32[2,1,256], index: 4, kind: output, shape index: {1}]  }
   0x1   :  { %10 = sst [smem:[#allocation2]] %s760_s0  ;;  %s682_s19 = smov 0  }
   0x2 LB: > { %s28_s0 = sadd.s32 1, %s640_s18  ;;  %p569_p0 = scmp.ge.s32.totalorder %s644_s19, 1  ;;  %s644_s19 = sphi %s682_s19, %s16_s19   ;;  %s640_s18 = sphi %s680_s18, %s768_s18   ;;  %s636_s17 = sphi %s678_s17, %s767_s17  }
   0x3   : > { %p30_p1 = scmp.ge.s32.totalorder %s28_s0, 2  ;;  %p201_p2 = scmp.lt.s32.totalorder %s644_s19, 3 }
   0x5   : > { %s770_s0 = smov (%p30_p1, %s28_s0), 0  ;;  %p202_p3 = pnand %p569_p0, %p201_p2 }
   0x6   : > { %p243_p4 = scmp.lt.s32.totalorder (!%p202_p3), %s636_s17, 1  ;;  %v273_v0 = vlaneseq (!%p202_p3)  ;;  %vm284_vm1 = vcmask (!%p202_p3), 1043456   ;;  %v646_v7 = vmov (!%p202_p3), 0.0   ;;  %v647_v63 = vmov (!%p202_p3), 1966171168   ;;  %s376_s8 = sld [smem:[#allocation2]] (!%p202_p3) }
   0x7   : > { %205 = sbr.rel (%p202_p3) target bundleno = 93 (0x5d), region = 32 }
   0x8   : > { %v696_v1 = vshrl.u32 (!%p202_p3), %v273_v0, 7  ;;  %vm698_vm0 = vcmp.lt.s32.totalorder (!%p202_p3), %v273_v0, 256  ;;  %v382_v0 = vunpack.c.l.s4 (!%p202_p3), %v647_v63 }
   0xa   : > { %v327_v3 = vsub.s32 (!%p202_p3), 0, %v696_v1  ;;  %v331_v4 = vsub.s32 (!%p202_p3), 1, %v696_v1 }
   0xe   : > { %s772_s17 = smov (!%p243_p4, %s636_s17), 1 }
   0xf   : > { %s578_s20 = sshll.u32 %s772_s17, 3  ;;  %s572_s21 = sshll.u32 %s772_s17, 1 }
  0x10   : > { %s250_s24 = scalar_lea.vmem %s761_s1, %s578_s20  ;;  %s259_s27 = scalar_lea.vmem %s762_s2, %s572_s21 }
  0x11   : > { %s713_s30 = scalar_lea.vmem %s763_s3, %s572_s21  ;;  %v279_v5 = vld [vmem:[%s250_s24] sm:$0xff]  ;;  %s720_s7 = scalar_lea.vmem %s764_s4, %s572_s21 }
  0x12   : > { %v715_v6 = vld [vmem:[%s259_s27] sm:$0x3]  ;;  %277 = vst.msk [vmem:[%s713_s30] sm:$0x3] %vm698_vm0, %v646_v7  ;;  %v282_v8 = vcombine.high %v279_v5, %v279_v5  ;;  %v285_v9 = vsel %vm284_vm1, %v279_v5, -inf }
  0x13   : > { %v328_v10 = vrot.slane %v715_v6, %v327_v3  ;;  %v332_v11 = vrot.slane %v715_v6, %v331_v4  ;;  %278 = vst.msk [vmem:[%s720_s7] sm:$0x3] %vm698_vm0, %v646_v7  ;;  %v286_v12 = vrot.slane %v285_v9, 4  ;;  %v383_v4 = vunpack.c.0.s8 %v382_v0 }
  0x14   : > { %v292_v13 = vsel %vm284_vm1, %v282_v8, -inf  ;;  %vm377_vm6 = vcmp.ne.s32.totalorder %v715_v6, 255 }
  0x15   : > { %vm333_vm2 = vcmp.eq.s32.totalorder %v696_v1, %v328_v10  ;;  %v287_v14 = vmax.f32 %v285_v9, %v286_v12  ;;  %v293_v15 = vrot.slane %v292_v13, 4  ;;  %vm334_vm3 = vcmp.eq.s32.totalorder %v696_v1, %v332_v11 }
  0x16   : > { %v335_v18 = vsel %vm333_vm2, %v279_v5, 0.0  ;;  %v336_v19 = vsel %vm334_vm3, %v282_v8, 0.0  ;;  %v386_v9 = vsub.s32 %v383_v4, %v696_v1 }
  0x17   : > { %v288_v16 = vrot.slane %v287_v14, 2  ;;  %v294_v17 = vmax.f32 %v292_v13, %v293_v15  ;;  %v337_v22 = vsel %vm284_vm1, %v335_v18, 0.0  ;;  %v344_v25 = vsel %vm284_vm1, %v336_v19, 0.0 }
  0x18   : > { %v338_v28 = vrot.slane %v337_v22, 4  ;;  %v345_v29 = vrot.slane %v344_v25, 4 }
  0x19   : > { %v289_v20 = vmax.f32 %v287_v14, %v288_v16  ;;  %v295_v21 = vrot.slane %v294_v17, 2  ;;  %v397_v16 = vstv %s376_s8 }
  0x1a   : > { %v339_v32 = vadd.f32 %v338_v28, %v337_v22  ;;  %v346_v33 = vadd.f32 %v345_v29, %v344_v25  ;;  %v649_v25 = vmov 0  }
  0x1b   : > { %v290_v23 = vrot.slane %v289_v20, 1  ;;  %v296_v24 = vmax.f32 %v294_v17, %v295_v21 }
  0x1c   : > { %v340_v36 = vrot.slane %v339_v32, 2  ;;  %v347_v37 = vrot.slane %v346_v33, 2 }
  0x1d   : > { %v291_v26 = vmax.f32 %v289_v20, %v290_v23  ;;  %v297_v27 = vrot.slane %v296_v24, 1 }
  0x1e   : > { %v341_v38 = vadd.f32 %v340_v36, %v339_v32  ;;  %v348_v39 = vadd.f32 %v347_v37, %v346_v33  ;;  %v447_v36 = vld [vmem:[%s720_s7] sm:$0x3] }
  0x1f   : > { %v298_v30 = vmax.f32 %v296_v24, %v297_v27 }
  0x20   : > { %v342_v40 = vrot.slane %v341_v38, 1  ;;  %v349_v41 = vrot.slane %v348_v39, 1 }
  0x21   : > { %v301_v31 = vcombine.low %v291_v26, %v298_v30 }
  0x22   : > { %v343_v43 = vadd.f32 %v342_v40, %v341_v38  ;;  %v350_v46 = vadd.f32 %v349_v41, %v348_v39 }
  0x23   : > { %v303_v34 = vsub.f32 %v279_v5, %v301_v31  ;;  %v648_v5 = vmov 1  }
  0x24   : > { %v351_v51 = vsub.f32 %v343_v43, %v291_v26  ;;  %v352_v52 = vsub.f32 %v350_v46, %v298_v30  ;;  %v380_v8 = vcombine.low %v648_v5, %v648_v5 }
  0x25   : > { %v304_v35 = vmul.f32 1.442695, %v303_v34 }
  0x26   : > { %v359_v57 = vmul.f32 1.442695, %v351_v51  ;;  %v361_v58 = vmul.f32 1.442695, %v352_v52  ;;  %v387_v15 = vrot.slane %v380_v8, %v386_v9 }
  0x27   : > { %608 = vpow2.f32 %v304_v35  ;;  %v419_v35 = vld [vmem:[%s713_s30] sm:$0x3] }
  0x28   : > { %610 = vpow2.f32 %v359_v57  ;;  %v394_v24 = vrot.slane %v387_v15, %v386_v9 }
  0x29   : > { %612 = vpow2.f32 %v361_v58 }
  0x2a   : > { %vm395_vm7 = vcmp.ne.s32.totalorder %v394_v24, 0 }
  0x2b   : > { %vm396_vm8 = vmand %vm377_vm6, %vm395_vm7 }
  0x31   : > { %v609_v42 = vpop.eup %608 }
  0x32   : > { %v307_v44 = vcombine.high %v609_v42, %v609_v42  ;;  %v309_v45 = vsel %vm284_vm1, %v609_v42, 0.0  ;;  %v611_v10 = vpop.eup %610 }
  0x33   : > { %v310_v47 = vrot.slane %v309_v45, 4  ;;  %v613_v11 = vpop.eup %612 }
  0x34   : > { %v316_v48 = vsel %vm284_vm1, %v307_v44, 0.0 }
  0x35   : > { %v311_v49 = vadd.f32 %v310_v47, %v309_v45  ;;  %v317_v50 = vrot.slane %v316_v48, 4 }
  0x37   : > { %v312_v53 = vrot.slane %v311_v49, 2  ;;  %v318_v54 = vadd.f32 %v317_v50, %v316_v48 }
  0x39   : > { %v313_v55 = vadd.f32 %v312_v53, %v311_v49  ;;  %v319_v56 = vrot.slane %v318_v54, 2 }
  0x3b   : > { %v314_v59 = vrot.slane %v313_v55, 1  ;;  %v320_v60 = vadd.f32 %v319_v56, %v318_v54 }
  0x3d   : > { %v315_v61 = vadd.f32 %v314_v59, %v313_v55  ;;  %v321_v62 = vrot.slane %v320_v60, 1 }
  0x3f   : > { %v322_v3 = vadd.f32 %v321_v62, %v320_v60  ;;  %614 = vlog2.f32 %v315_v61 }
  0x40   : > { %616 = vrcp.f32 %v315_v61 }
  0x41   : > { %618 = vlog2.f32 %v322_v3 }
  0x42   : > { %620 = vrcp.f32 %v322_v3 }
  0x49   : > { %v615_v12 = vpop.eup %614 }
  0x4a   : > { %v617_v13 = vpop.eup %616  ;;  %v354_v14 = vmul.f32 0.6931472, %v615_v12 }
  0x4b   : > { %v619_v17 = vpop.eup %618  ;;  %v364_v18 = vmul.f32 %v617_v13, %v611_v10 }
  0x4c   : > { %v621_v19 = vpop.eup %620  ;;  %v356_v20 = vmul.f32 0.6931472, %v619_v17  ;;  %v357_v21 = vsub.f32 %v351_v51, %v354_v14 }
  0x4d   : > { %v366_v22 = vmul.f32 %v621_v19, %v613_v11  ;;  %vm398_vm4 = vcmp.le.f32.partialorder %v364_v18, %v397_v16 }
  0x4e   : > { %v358_v23 = vsub.f32 %v352_v52, %v356_v20  ;;  %v400_v26 = vsel %vm398_vm4, 1, %v649_v25  ;;  %v420_v1 = vsub.f32 0.0, %v357_v21 }
  0x4f   : > { %vm399_vm5 = vcmp.le.f32.partialorder %v366_v22, %v397_v16 }
  0x50   : > { %v401_v27 = vsel %vm399_vm5, 1, %v649_v25  ;;  %v421_v28 = vsub.f32 0.0, %v358_v23 }
  0x51   : > { %v402_v29 = vcombine.low %v400_v26, %v401_v27 }
  0x52   : > { %v424_v30 = vcombine.low %v420_v1, %v421_v28 }
  0x53   : > { %v409_v31 = vrot.slane %v402_v29, %v386_v9 }
  0x54   : > { %v431_v32 = vrot.slane %v424_v30, %v386_v9 }
  0x55   : > { %v416_v33 = vrot.slane %v409_v31, %v386_v9 }
  0x56   : > { %v438_v34 = vrot.slane %v431_v32, %v386_v9 }
  0x57   : > { %vm417_vm9 = vcmp.ne.s32.totalorder %v416_v33, 0 }
  0x58   : > { %vm418_vm10 = vmand %vm396_vm8, %vm417_vm9 }
  0x59   : > { %v440_v37 = vsel %vm418_vm10, %v438_v34, 0.0  ;;  %v575_v38 = vsel %vm418_vm10, 1.0, %v646_v7 }
  0x5a   : > { %v441_v39 = vadd.f32 %v440_v37, %v419_v35  ;;  %v450_v40 = vadd.f32 %v575_v38, %v447_v36 }
  0x5c   : > { %446 = vst.msk [vmem:[%s713_s30] sm:$0x3] %vm698_vm0, %v441_v39  ;;  %451 = vst.msk [vmem:[%s720_s7] sm:$0x3] %vm698_vm0, %v450_v40 }
  0x5d PF: > { %s16_s19 = sadd.s32 1, %s644_s19   ;;  %s767_s17 = smov %s640_s18 }
  0x5e   : > { %p13_p5 = scmp.ge.s32.totalorder %s16_s19, 4   ;;  %s768_s18 = smov %s770_s0 }
  0x60   :  { %15 = sbr.rel (!%p13_p5) target bundleno = 2 (0x2), region = 81 }

</bundles_post_ra>
